<compile_context>
chip_gen: v5e
topology: v5e:2x2
jax: 0.10.0
libtpu: 0.0.40
codegen_flags: <defaults>
</compile_context>

<pallas_src>
import jax
import jax.numpy as jnp
from jax.experimental import pallas as pl
from jax.experimental.pallas import tpu as pltpu


# --------------------------------------------------------------------------
# Kernels
# --------------------------------------------------------------------------
def _control_fused_kernel(x_ref,      # (tm, K)  f32
                          w_ref,      # (K, tn)  bf16
                          bias_ref,   # (1, tn)  f32
                          ctrl_ref,   # (1, tn)  f32
                          mask_ref,   # (tm, 1)  f32
                          o_ref):     # (tm, tn) out dtype
    """Single-K-step path: no accumulator scratch, straight to o_ref."""
    y = jnp.dot(x_ref[...].astype(jnp.bfloat16), w_ref[...],
                preferred_element_type=jnp.float32)
    ctrl = ctrl_ref[...] * 1.5                       # scale (1, tn) pre-broadcast
    o_ref[...] = (y + bias_ref[...] + ctrl * mask_ref[...]).astype(o_ref.dtype)


def _control_acc_kernel(x_ref,        # (tm, tk) f32
                        w_ref,        # (tk, tn) bf16
                        bias_ref,     # (1, tn)  f32
                        ctrl_ref,     # (1, tn)  f32
                        mask_ref,     # (tm, 1)  f32
                        o_ref,        # (tm, tn) out dtype
                        acc_ref):     # (tm, tn) f32 scratch
    """Multi-K-step path: K is the last ('arbitrary') grid axis."""
    k = pl.program_id(2)
    partial = jnp.dot(x_ref[...].astype(jnp.bfloat16), w_ref[...],
                      preferred_element_type=jnp.float32)

    @pl.when(k == 0)
    def _():                                 # first-iteration overwrite (no zero-init pass)
        acc_ref[...] = partial

    @pl.when(k > 0)
    def _():
        acc_ref[...] += partial

    @pl.when(k == pl.num_programs(2) - 1)
    def _():
        ctrl = ctrl_ref[...] * 1.5
        o_ref[...] = (acc_ref[...] + bias_ref[...]
                      + ctrl * mask_ref[...]).astype(o_ref.dtype)
        # norm_pre / norm_post rescale of the reference is the identity here
        # (both norms taken on the same post-operator tensor) -> omitted.


# --------------------------------------------------------------------------
# Wrapper
# --------------------------------------------------------------------------
def _pick_tile(dim, preferred, align):
    """Largest multiple of `align` <= preferred that divides `dim`, else the
    full dimension (always legal under the (8,128) full-extent rule)."""
    if dim <= preferred:
        return dim
    t = (preferred // align) * align
    while t >= align:
        if dim % t == 0:
            return t
        t -= align
    return dim


def _vmem_limit_bytes():
    """~3/4 of physical VMEM (48 MiB on v7x, 96 MiB on v5e/v6e), capped."""
    cap = 64 * 1024 * 1024
    try:
        cap = int(getattr(pltpu.get_tpu_info(), "vmem_capacity_bytes", cap))
    except Exception:
        pass
    return min(cap * 3 // 4, 112 * 1024 * 1024)


def control_layer_forward(x, w, b, control, position_ids=None, *,
                          max_tk=None, out_dtype=None):
    """Pallas implementation of ControlLayer.forward with a Linear block.

    x:            (B, S, H_in)  float32 activations
    w:            (H_in, H_out) float32 block weight
    b:            (H_out,)      float32 block bias
    control:      (H_out,)      float32 control vector (len(shape)==1 path)
    position_ids: (B, S) int32 or None
    """
    B, S, H_in = x.shape
    H_out = w.shape[1]
    M = B * S
    out_dtype = out_dtype or x.dtype

    # Glue: per-row control mask (matches the torch cumsum/argmax construction).
    # Tiny (B*S, 1) array; lets row tiles span batch boundaries.
    if position_ids is not None:
        is_zero = (position_ids == 0).astype(jnp.int32)
        zero_idx = jnp.argmax(jnp.cumsum(is_zero, axis=1), axis=1)        # (B,)
        col = jnp.arange(S, dtype=jnp.int32)[None, :]
        mask = (col >= zero_idx[:, None]).astype(jnp.float32)             # (B, S)
    else:
        mask = jnp.ones((B, S), jnp.float32)
    mask_rows = mask.reshape(M, 1)

    x2 = x.reshape(M, H_in)                        # stays f32; cast in-kernel
    w_bf = w.astype(jnp.bfloat16)                  # in a real model: convert once at init
    bias2 = b.reshape(1, H_out).astype(jnp.float32)
    ctrl2 = control.reshape(1, H_out).astype(jnp.float32)

    # Tile sizes: big tiles for reuse, but keep the row grid >= 2 tiles when
    # possible so v7x megacore can split the parallel axes.
    tm = _pick_tile(M, min(1024, max(8, M // 2)), 8)
    tn = _pick_tile(H_out, 512, 128)
    tk = _pick_tile(H_in, max_tk if max_tk is not None else 1024, 128)
    grid_m, grid_n, grid_k = M // tm, H_out // tn, H_in // tk

    cost = pl.CostEstimate(
        flops=2 * M * H_in * H_out,
        transcendentals=0,
        bytes_accessed=(grid_n * M * H_in * 4          # x (re-streamed per N tile)
                        + grid_m * H_in * H_out * 2    # W (re-streamed per row tile)
                        + M * H_out * jnp.dtype(out_dtype).itemsize
                        + M * 4 + 2 * H_out * 4),
    )
    vmem_limit = _vmem_limit_bytes()

    if grid_k == 1:
        grid_spec = pltpu.PrefetchScalarGridSpec(
            num_scalar_prefetch=0,
            grid=(grid_m, grid_n),
            in_specs=[
                pl.BlockSpec((tm, tk), lambda i, j: (i, 0)),   # x
                pl.BlockSpec((tk, tn), lambda i, j: (0, j)),   # W
                pl.BlockSpec((1, tn),  lambda i, j: (0, j)),   # bias
                pl.BlockSpec((1, tn),  lambda i, j: (0, j)),   # control
                pl.BlockSpec((tm, 1),  lambda i, j: (i, 0)),   # per-row mask
            ],
            out_specs=pl.BlockSpec((tm, tn), lambda i, j: (i, j)),
        )
        kernel = _control_fused_kernel
        dim_sem = ("parallel", "parallel")
    else:
        grid_spec = pltpu.PrefetchScalarGridSpec(
            num_scalar_prefetch=0,
            grid=(grid_m, grid_n, grid_k),
            in_specs=[
                pl.BlockSpec((tm, tk), lambda i, j, k: (i, k)),   # x
                pl.BlockSpec((tk, tn), lambda i, j, k: (k, j)),   # W
                pl.BlockSpec((1, tn),  lambda i, j, k: (0, j)),   # bias
                pl.BlockSpec((1, tn),  lambda i, j, k: (0, j)),   # control
                pl.BlockSpec((tm, 1),  lambda i, j, k: (i, 0)),   # per-row mask
            ],
            out_specs=pl.BlockSpec((tm, tn), lambda i, j, k: (i, j)),
            scratch_shapes=[pltpu.VMEM((tm, tn), jnp.float32)],
        )
        kernel = _control_acc_kernel
        dim_sem = ("parallel", "parallel", "arbitrary")

    out_flat = pl.pallas_call(
        kernel,
        out_shape=jax.ShapeDtypeStruct((M, H_out), out_dtype),
        grid_spec=grid_spec,
        compiler_params=pltpu.CompilerParams(
            dimension_semantics=dim_sem,
            vmem_limit_bytes=vmem_limit,
        ),
        cost_estimate=cost,
    )(x2, w_bf, bias2, ctrl2, mask_rows)

    return out_flat.reshape(B, S, H_out)


# --------------------------------------------------------------------------
# Plain-JAX reference (mirrors the PyTorch forward; same bf16 MXU feed)
# --------------------------------------------------------------------------
def _reference(x, w, b, control, position_ids):
    B, S, H_in = x.shape
    H_out = w.shape[1]
    y = jnp.dot(x.reshape(B * S, H_in).astype(jnp.bfloat16),
                w.astype(jnp.bfloat16),
                preferred_element_type=jnp.float32).reshape(B, S, H_out)
    y = y + b[None, None, :]
    if position_ids is not None:
        is_zero = (position_ids == 0).astype(jnp.int32)
        zero_idx = jnp.argmax(jnp.cumsum(is_zero, axis=1), axis=1)
        col = jnp.arange(S)[None, :]
        mask = (col >= zero_idx[:, None]).astype(jnp.float32)[..., None]
    else:
        mask = jnp.ones((B, S, 1), jnp.float32)
    modified = y + control.reshape(1, 1, H_out) * mask * 1.5
    # norm_pre == norm_post in this source, so the rescale is identity.
    return modified.astype(x.dtype)


# --------------------------------------------------------------------------
if __name__ == "__main__":
    key = jax.random.PRNGKey(0)
    k_x, k_w, k_b, k_c, k_x2, k_w2, k_b2, k_c2 = jax.random.split(key, 8)

    # --- Test 1: small block shapes, left-padded batch, fused single-K path.
    B, S, H = 2, 8, 32
    x = jax.random.normal(k_x, (B, S, H), dtype=jnp.float32)
    w = jax.random.normal(k_w, (H, H), dtype=jnp.float32) * 0.1
    b = jax.random.normal(k_b, (H,), dtype=jnp.float32) * 0.1
    control = jax.random.normal(k_c, (H,), dtype=jnp.float32)
    # batch 0: no left padding; batch 1: zeros up to index 2 (last zero at 2).
    position_ids = jnp.stack(
        [jnp.arange(S, dtype=jnp.int32),
         jnp.concatenate([jnp.zeros(3, jnp.int32),
                          jnp.arange(1, S - 2, dtype=jnp.int32)])],
        axis=0)

    out1 = jax.block_until_ready(
        control_layer_forward(x, w, b, control, position_ids))
    ref1 = _reference(x, w, b, control, position_ids)
    assert out1.shape == (B, S, H)
    assert jnp.allclose(out1, ref1, atol=2e-2, rtol=2e-2), \
        float(jnp.max(jnp.abs(out1 - ref1)))

    # --- Test 2: no position_ids (mask of ones) + forced K split (acc path).
    B2, S2, Hi, Ho = 2, 16, 256, 64
    x_b = jax.random.normal(k_x2, (B2, S2, Hi), dtype=jnp.float32)
    w_b = jax.random.normal(k_w2, (Hi, Ho), dtype=jnp.float32) * 0.05
    b_b = jax.random.normal(k_b2, (Ho,), dtype=jnp.float32) * 0.1
    c_b = jax.random.normal(k_c2, (Ho,), dtype=jnp.float32)

    out2 = jax.block_until_ready(
        control_layer_forward(x_b, w_b, b_b, c_b, None, max_tk=128))
    ref2 = _reference(x_b, w_b, b_b, c_b, None)
    assert out2.shape == (B2, S2, Ho)
    assert jnp.allclose(out2, ref2, atol=2e-2, rtol=2e-2), \
        float(jnp.max(jnp.abs(out2 - ref2)))

    # TODO(synk): tuple-output passthrough and the runtime try/except fallback
    # of ControlLayer.forward are Python-level control flow, not kernel work.
    print("KERNEL_OK")
</pallas_src>

<mosaic_0001>
module attributes {stable_mosaic.version = 11 : i64} {
  func.func @_control_fused_kernel(%arg0: i32, %arg1: i32, %arg2: memref<8x32xf32, #tpu.memory_space<vmem>>, %arg3: memref<32x32xbf16, #tpu.memory_space<vmem>>, %arg4: memref<1x32xf32, #tpu.memory_space<vmem>>, %arg5: memref<1x32xf32, #tpu.memory_space<vmem>>, %arg6: memref<8x1xf32, #tpu.memory_space<vmem>>, %arg7: memref<8x32xf32, #tpu.memory_space<vmem>>) attributes {dimension_semantics = [#tpu.dimension_semantics<parallel>, #tpu.dimension_semantics<parallel>], iteration_bounds = array<i64: 2, 1>, scalar_prefetch = 0 : i64, scratch_operands = 0 : i64, tpu.core_type = #tpu.core_type<tc>, window_params = [{transform_indices = @transform_0, window_bounds = array<i64: 8, 32>}, {transform_indices = @transform_1, window_bounds = array<i64: 32, 32>}, {transform_indices = @transform_2, window_bounds = array<i64: 1, 32>}, {transform_indices = @transform_3, window_bounds = array<i64: 1, 32>}, {transform_indices = @transform_4, window_bounds = array<i64: 8, 1>}, {transform_indices = @transform_5, window_bounds = array<i64: 8, 32>}]} {
    %c0 = arith.constant 0 : index
    %c0_0 = arith.constant 0 : index
    %0 = vector.load %arg2[%c0, %c0_0] : memref<8x32xf32, #tpu.memory_space<vmem>>, vector<8x32xf32>
    %1 = arith.truncf %0 : vector<8x32xf32> to vector<8x32xbf16>
    %c0_1 = arith.constant 0 : index
    %c0_2 = arith.constant 0 : index
    %2 = vector.load %arg3[%c0_1, %c0_2] : memref<32x32xbf16, #tpu.memory_space<vmem>>, vector<32x32xbf16>
    %cst = arith.constant dense<0.000000e+00> : vector<8x32xf32>
    %3 = tpu.matmul %1, %2, %cst {dimension_numbers = #tpu.dot_dimension_numbers<[1], [0], [0], [1], [0, 0, 1, 1], [], []>} : vector<8x32xbf16>, vector<32x32xbf16>, vector<8x32xf32> -> vector<8x32xf32>
    %c0_3 = arith.constant 0 : index
    %c0_4 = arith.constant 0 : index
    %4 = vector.load %arg5[%c0_3, %c0_4] : memref<1x32xf32, #tpu.memory_space<vmem>>, vector<1x32xf32>
    %cst_5 = arith.constant 1.500000e+00 : f32
    %5 = vector.broadcast %cst_5 : f32 to vector<1x32xf32>
    %6 = arith.mulf %4, %5 : vector<1x32xf32>
    %c0_6 = arith.constant 0 : index
    %c0_7 = arith.constant 0 : index
    %7 = vector.load %arg4[%c0_6, %c0_7] : memref<1x32xf32, #tpu.memory_space<vmem>>, vector<1x32xf32>
    %8 = vector.broadcast %7 : vector<1x32xf32> to vector<8x32xf32>
    %9 = arith.addf %3, %8 : vector<8x32xf32>
    %c0_8 = arith.constant 0 : index
    %c0_9 = arith.constant 0 : index
    %10 = vector.load %arg6[%c0_8, %c0_9] : memref<8x1xf32, #tpu.memory_space<vmem>>, vector<8x1xf32>
    %11 = vector.broadcast %6 : vector<1x32xf32> to vector<8x32xf32>
    %12 = vector.broadcast %10 : vector<8x1xf32> to vector<8x32xf32>
    %13 = arith.mulf %11, %12 : vector<8x32xf32>
    %14 = arith.addf %9, %13 : vector<8x32xf32>
    %c0_10 = arith.constant 0 : index
    %c0_11 = arith.constant 0 : index
    %15 = vector.load %arg7[%c0_10, %c0_11] : memref<8x32xf32, #tpu.memory_space<vmem>>, vector<8x32xf32>
    tpu.vector_store %arg7[%c0_10, %c0_11], %14 {strides = array<i32>} : memref<8x32xf32, #tpu.memory_space<vmem>>, vector<8x32xf32>,
    return
  }
  func.func @transform_0(%arg0: i32, %arg1: i32) -> (i32, i32) {
    %c0_i32 = arith.constant 0 : i32
    %c0_i32_0 = arith.constant 0 : i32
    return %arg0, %c0_i32 : i32, i32
  }
  func.func @transform_1(%arg0: i32, %arg1: i32) -> (i32, i32) {
    %c0_i32 = arith.constant 0 : i32
    %c0_i32_0 = arith.constant 0 : i32
    return %c0_i32, %arg1 : i32, i32
  }
  func.func @transform_2(%arg0: i32, %arg1: i32) -> (i32, i32) {
    %c0_i32 = arith.constant 0 : i32
    %c0_i32_0 = arith.constant 0 : i32
    return %c0_i32, %arg1 : i32, i32
  }
  func.func @transform_3(%arg0: i32, %arg1: i32) -> (i32, i32) {
    %c0_i32 = arith.constant 0 : i32
    %c0_i32_0 = arith.constant 0 : i32
    return %c0_i32, %arg1 : i32, i32
  }
  func.func @transform_4(%arg0: i32, %arg1: i32) -> (i32, i32) {
    %c0_i32 = arith.constant 0 : i32
    %c0_i32_0 = arith.constant 0 : i32
    return %arg0, %c0_i32 : i32, i32
  }
  func.func @transform_5(%arg0: i32, %arg1: i32) -> (i32, i32) {
    %c0_i32 = arith.constant 0 : i32
    return %arg0, %arg1 : i32, i32
  }
}

</mosaic_0001>

<bundles_post_ra>
// kernel: tpu_custom_call.1
= control target key start
LH: loop header
LB: loop body
LE: loop exit
PB: predicated region body
PF: predicated region fallthrough
CT: control target
= control target key end

     0   :  { %10 = vsyncpa [#allocation3], 0  ;;  %s849_s0 = inlined_call_operand.vmem [shape: f32[16,32], index: 0, kind: input, shape index: {}]   ;;  %s850_s1 = inlined_call_operand.hbm [shape: bf16[32,32], index: 1, kind: input, shape index: {}]   ;;  %s851_s2 = inlined_call_operand.vmem [shape: f32[1,32], index: 2, kind: input, shape index: {}]   ;;  %s852_s3 = inlined_call_operand.vmem [shape: f32[1,32], index: 3, kind: input, shape index: {}]   ;;  %s853_s4 = inlined_call_operand.vmem [shape: f32[16,1], index: 4, kind: input, shape index: {}]   ;;  %s854_s5 = inlined_call_operand.hbm [shape: f32[16,32], index: 5, kind: output, shape index: {}]  }
   0x1   :  { %11 = vsyncpa [#allocation4], 0 }
   0x2   :  { %13 = vsyncpa [#allocation4 + $0x1], 0  ;;  %s738_s18 = smov 0   ;;  %s740_s19 = smov 0  }
   0x3   :  { %s742_s20 = smov 0   ;;  %s744_s21 = smov 0  }
   0x4   :  { %s746_s22 = smov 0   ;;  %s748_s23 = smov 0  }
   0x5 LB: > { %s492_s24 = sadd.s32 4294967295, %s702_s23   ;;  %s493_s25 = sadd.s32 4294967294, %s702_s23   ;;  %s702_s23 = sphi %s748_s23, %s19_s23   ;;  %s698_s22 = sphi %s746_s22, %s861_s22   ;;  %s694_s21 = sphi %s744_s21, %s860_s21   ;;  %s690_s20 = sphi %s742_s20, %s859_s20   ;;  %s686_s19 = sphi %s740_s19, %s858_s19   ;;  %s682_s18 = sphi %s738_s18, %s857_s18  }
   0x6   : > { %s31_s26 = sadd.s32 1, %s698_s22  ;;  %s170_s27 = sadd.s32 1, %s690_s20 }
   0x7   : > { %p33_p0 = scmp.ge.s32.totalorder %s31_s26, 2  ;;  %p180_p1 = scmp.ne.s32.totalorder %s690_s20, %s686_s19 }
   0x8   : > { %p181_p2 = scmp.eq.s32.totalorder %s492_s24, 1  ;;  %p186_p3 = scmp.ne.s32.totalorder %s686_s19, %s682_s18 }
   0x9   : > { %s863_s26 = smov (%p33_p0, %s31_s26), 0  ;;  %p187_p5 = scmp.eq.s32.totalorder %s493_s25, 1 }
   0xa   : > { %p778_p4 = por %p181_p2, %p180_p1  ;;  %s165_s29 = ssub.s32 %s698_s22, %s863_s26 }
   0xb   : > { %p494_p6 = scmp.ge.s32.totalorder %s702_s23, 1  ;;  %p168_p7 = scmp.eq.s32.totalorder %s165_s29, 0 }
   0xc   : > { %p785_p8 = por %p187_p5, %p186_p3  ;;  %p194_p9 = scmp.lt.s32.totalorder %s702_s23, 3 }
   0xd   : > { %s791_s6 = scalar_select %p168_p7, %s690_s20, %s170_s27  }
   0xe   : > { %p195_p10 = pnand %p494_p6, %p194_p9  ;;  %p533_p11 = scmp.eq.s32.totalorder %s492_s24, 0 }
   0xf   : > { %s207_s9 = sshll.u32 %s850_s1, 4  ;;  %s704_s10 = smov [#allocation2]   ;;  %s208_s9 = int_to_ptr.hbm [resolvable:$true] %s207_s9 }
  0x10   : > { %p525_p12 = pneg %p195_p10  ;;  %s209_s11 = sshll.u32 %s704_s10, 4  ;;  %s210_s11 = int_to_ptr.vmem [resolvable:$true] %s209_s11 }
  0x11   : > { %s705_s12 = smov 64   ;;  %s706_s13 = smov 4  }
  0x12   : > { %p526_p13 = pnand %p533_p11, %p525_p12  ;;  %251 = sbr.rel (%p195_p10) target bundleno = 168 (0xa8), region = 40 }
  0x14   : > { %528 = dma.hbm_to_vmem [thread:$0]  (!%p526_p13), %s208_s9, 256, %s210_s11, [#allocation3], %s705_s12, %s705_s12, %s706_s13  }
  0x17   : > { %673 = dma.done.wait (%p533_p11), [#allocation3], 256  }
  0x18   : > { %675 = vsyncadd (%p533_p11), [#allocation3], 4294967040  ;;  %p289_p0 = scmp.lt.s32.totalorder %s694_s21, 1  ;;  %v707_v0 = vmov 0   ;;  %v518_v1 = vld [vmem:[#allocation2 + $0x8] sm:$0xff]  ;;  %v517_v3 = vld [vmem:[#allocation2] sm:$0xff] }
  0x19   : > { %588 = vset.pattern.permute.xlu0 %v707_v0  ;;  %338 = vmatpush.bf16.msra.mxu0 %v518_v1  ;;  %vm328_vm0 = vcmask 261120   ;;  %v310_v6 = vld [vmem:[%s852_s3] sm:$0x1]  ;;  %s286_s9 = sand.u32 1, %s686_s19   ;;  %s514_s11 = sshll.u32 %s694_s21, 3 }
  0x1a   : > { %s290_s14 = scalar_select %p289_p0, %s694_s21, 1  ;;  %v311_v7 = vmul.f32 1.5, %v310_v6  ;;  %v589_v10 = vld [vmem:[%s851_s2] ss:$0 sm:$0xff] }
  0x1b   : > { %s501_s10 = sshll.u32 %s286_s9, 3  ;;  %s369_s16 = scalar_lea.hbm %s854_s5, %s514_s11 }
  0x1c   : > { %s502_s15 = sshll.u32 %s290_s14, 3  ;;  %v347_v8 = vperm.slane %v311_v7, 0  ;;  %s288_s17 = scalar_lea.vmem [#allocation5], %s501_s10 }
  0x1d   : > { %s302_s24 = scalar_lea.vmem %s853_s4, %s502_s15  ;;  %s292_s29 = scalar_lea.vmem %s849_s0, %s502_s15  ;;  %339 = vmatpush.bf16.msra.mxu0 %v517_v3 }
  0x1e   : > { %v345_v2 = vld [vmem:[%s302_s24] sm:$0xff]  ;;  %s371_s24 = sshll.u32 %s288_s17, 4  ;;  %s373_s25 = sshll.u32 %s369_s16, 4  ;;  %s372_s24 = int_to_ptr.vmem [resolvable:$true] %s371_s24  ;;  %s374_s25 = int_to_ptr.hbm [resolvable:$true] %s373_s25 }
  0x1f   : > { %v304_v4 = vld [vmem:[%s292_s29] sm:$0xff]  ;;  %351 = vperm.xlu0 %588, %v345_v2   ;;  %s358_s21 = scalar_lea.sflag [#allocation4], %s286_s9  ;;  %s634_s27 = sshra.s32 %s374_s25, 4  ;;  %s635_s27 = int_to_ptr.hbm [resolvable:$true] %s634_s27 }
  0x20   : > { %v305_v5 = vpack.c.bf16 %v304_v4, %v304_v4  ;;  %s636_s29 = scalar_lea.hbm %s635_s27, 8  ;;  %s640_s10 = scalar_lea.hbm %s854_s5, 16 }
  0x21   : > { %p637_p1 = scmp.ne.s32.totalorder %s635_s27, %s636_s29  ;;  %p641_p5 = scmp.lt.s32.totalorder %s635_s27, %s854_s5 }
  0x22   : > { %512 = vmatmul.msk.bf16.vlgmr.msra.gmra.mxu0 %vm328_vm0, %v305_v5  ;;  %p642_p6 = scmp.lt.s32.totalorder %s640_s10, %s636_s29 }
  0x23   : > { %p638_p2 = pnand %p637_p1, %p778_p4 }
  0x24   : > { %p643_p7 = por %p642_p6, %p641_p5 }
  0x25   : > { %p639_p3 = pneg %p638_p2 }
  0x27   : > { %p644_p9 = pnand %p643_p7, %p639_p3 }
  0x91   : > { %v352_v9 = vpop.permute.xlu0 %351 }
  0x92   : > { %v354_v11 = vmul.f32 %v352_v9, %v347_v8 }
  0x9f   : > { %v341_v12 = vpop.f32.mrf.mxu0 }
  0xa0   : > { %v342_v13 = vadd.f32 %v589_v10, %v341_v12 }
  0xa2   : > { %v355_v14 = vadd.f32 %v354_v11, %v342_v13 }
  0xa4   : > { %356 = vst.msk [vmem:[%s288_s17] sm:$0xff] %vm328_vm0, %v355_v14 }
  0xa5   : > { %647 = shalt.err (!%p644_p9)
}
  0xa6   : > { %523 = dma.vmem_to_hbm [thread:$0]  (%p778_p4), %s372_s24, 128, %s374_s25, %s358_s21  }
  0xa7   : > { %v343_v15 = vpop.f32.mrf.mxu0 }
  0xa8 PF: > { %p535_p10 = scmp.ge.s32.totalorder %s702_s23, 2  ;;  %s385_s9 = sand.u32 1, %s682_s18  }
  0xa9   : > { %s386_s13 = scalar_lea.sflag [#allocation4], %s385_s9 }
  0xaa   : > { %p530_p11 = pnand %p535_p10, %p785_p8 }
  0xac   : > { %p531_p12 = pneg %p530_p11 }
  0xae   : > { %677 = dma.done.wait (%p531_p12), %s386_s13, 128  }
  0xaf   : > { %679 = vsyncadd (%p531_p12), %s386_s13, 4294967168  ;;  %s19_s23 = sadd.s32 1, %s702_s23   ;;  %s857_s18 = smov %s686_s19 }
  0xb0   : > { %p16_p13 = scmp.ge.s32.totalorder %s19_s23, 4   ;;  %s858_s19 = smov %s690_s20 }
  0xb1   : > { %s859_s20 = smov %s791_s6  ;;  %s860_s21 = smov %s698_s22 }
  0xb2   : > { %s861_s22 = smov %s863_s26  ;;  %18 = sbr.rel (!%p16_p13) target bundleno = 5 (0x5), region = 90 }
  0xb7   :  { %392 = vsyncpa [#allocation3], 1 }
  0xb8   :  { %394 = vsyncpa [#allocation3 + $0x1], 1 }
  0xb9   :  { %395 = vsyncpa [#allocation4], 1 }
  0xba   :  { %397 = vsyncpa [#allocation4 + $0x1], 1 }

</bundles_post_ra>
